<compile_context>
chip_gen: v7x
topology: tpu7x:2x2x1
jax: 0.10.0
libtpu: 0.0.40
codegen_flags: <defaults>
</compile_context>

<pallas_src>
import jax
import jax.numpy as jnp
from jax.experimental import pallas as pl
from jax.experimental.pallas import tpu as pltpu

LEAKY_SLOPE = 0.01  # PyTorch nn.LeakyReLU default negative_slope


def _round_up(x, m):
    return ((x + m - 1) // m) * m


def _leaky_relu(x):
    return jnp.where(x > 0, x, LEAKY_SLOPE * x)


def _pad2(a, rows, cols, dtype):
    """Zero-pad a 2-D array to (rows, cols) and cast."""
    out = jnp.zeros((rows, cols), dtype)
    return out.at[: a.shape[0], : a.shape[1]].set(a.astype(dtype))


def _choose_batch_tile(B, max_tile=2048):
    """Batch tile: multiple of 8 sublanes, >= 4 grid steps when B allows
    (DMA/compute overlap + both v7x TensorCores), capped so double-buffered
    f32 x tiles + resident weights + intermediates stay well inside every
    generation's VMEM (v7x: 64 MiB physical)."""
    if B <= 8:
        return B  # full-dim block; tiny problem, single grid step
    tb = _round_up(-(-B // 4), 8)
    return max(8, min(tb, max_tile))


def _vmem_limit_bytes():
    """Per-generation scoped-VMEM budget: ~75% of physical, capped at 96 MiB
    (v5e/v6e have 128 MiB, v7x 64 MiB). Conservative fallback if the query
    is unavailable."""
    try:
        cap = getattr(pltpu.get_tpu_info(), "vmem_capacity_bytes", None)
        if cap:
            return int(min(cap * 3 // 4, 96 * 1024 * 1024))
    except Exception:  # pragma: no cover - defensive
        pass
    return 48 * 1024 * 1024


def mnist_disc_kernel(x_ref,
                      w1_ref, b1_ref,
                      w2_ref, b2_ref,
                      w3_ref, b3_ref,
                      w4_ref, b4_ref,
                      out_ref):
    # Layer 1: x streams from HBM as f32; cast to bf16 right before the MXU
    # (bf16 operands, f32 accumulation).  K = D is handled by Mosaic's layout.
    x = x_ref[...].astype(jnp.bfloat16)
    h = jnp.dot(x, w1_ref[...], preferred_element_type=jnp.float32)
    h = _leaky_relu(h + b1_ref[...])

    # Layer 2: (tb, H1p) @ (H1p, H2p) — all widths padded to 128 lanes.
    h = jnp.dot(h.astype(jnp.bfloat16), w2_ref[...],
                preferred_element_type=jnp.float32)
    h = _leaky_relu(h + b2_ref[...])

    # Layer 3: (tb, H2p) @ (H2p, H3p)
    h = jnp.dot(h.astype(jnp.bfloat16), w3_ref[...],
                preferred_element_type=jnp.float32)
    h = _leaky_relu(h + b3_ref[...])

    # Layer 4: contract the padded hidden lanes against w4 (1, H3p) producing a
    # lane-dense (1, tb) row directly (w4's zero padding keeps it exact), so the
    # output store is a single unmasked row instead of a 1-lane column.
    logits = jnp.einsum('oh,bh->ob', w4_ref[...], h,
                        preferred_element_type=jnp.float32) + b4_ref[0]
    # Exact sigmoid: EUP exp + exact reciprocal (EUP slot has plenty of slack).
    out_ref[...] = 1.0 / (1.0 + jnp.exp(-logits))


def mnist_discriminator(x, params, *, max_batch_tile=2048):
    """x: (B, D) float32; params: list of 4 (W, b) with W:(in, out), b:(1, out).

    Returns (B,) float32 — matches torch's `.squeeze(dim=1)` output.
    bf16 matmul operands are an intentional accuracy/bandwidth trade vs the
    pure-f32 PyTorch module.
    """
    (w1, b1), (w2, b2), (w3, b3), (w4, b4) = params
    B, D = x.shape
    H1, H2, H3 = w1.shape[1], w2.shape[1], w3.shape[1]
    H1p, H2p, H3p = (_round_up(h, 128) for h in (H1, H2, H3))

    # Weight prep (KB-scale, one-time): pad hidden widths to 128 lanes. Zero
    # bias padding keeps padded columns exactly 0 through LeakyReLU, so the
    # final w4 reduce (also zero-padded) is unchanged.
    w1_p = _pad2(w1, D, H1p, jnp.bfloat16)
    b1_p = _pad2(b1, 1, H1p, jnp.float32)
    w2_p = _pad2(w2, H1p, H2p, jnp.bfloat16)
    b2_p = _pad2(b2, 1, H2p, jnp.float32)
    w3_p = _pad2(w3, H2p, H3p, jnp.bfloat16)
    b3_p = _pad2(b3, 1, H3p, jnp.float32)
    w4_p = _pad2(w4.reshape(1, -1), 1, H3p, jnp.float32)
    b4_s = b4.reshape(1).astype(jnp.float32)  # scalar bias -> SMEM

    tb = _choose_batch_tile(B, max_batch_tile)
    num_tiles = -(-B // tb)   # partial last tile is handled by Pallas padding;
                              # its rows are sliced off below.

    def resident(arr):
        # Whole-array block, constant block index -> DMA'd once, VMEM-resident.
        return pl.BlockSpec(arr.shape, lambda i: (0, 0))

    out = pl.pallas_call(
        mnist_disc_kernel,
        out_shape=jax.ShapeDtypeStruct((num_tiles, tb), jnp.float32),
        grid_spec=pltpu.PrefetchScalarGridSpec(
            num_scalar_prefetch=0,
            grid=(num_tiles,),
            in_specs=[
                # x: streamed f32 tiles, unpadded (full-array last-dim block).
                pl.BlockSpec((tb, D), lambda i: (i, 0)),
                resident(w1_p), resident(b1_p),
                resident(w2_p), resident(b2_p),
                resident(w3_p), resident(b3_p),
                resident(w4_p),
                pl.BlockSpec(memory_space=pltpu.MemorySpace.SMEM),  # b4 scalar
            ],
            # Lane-dense output: one (1, tb) row per grid step.
            out_specs=pl.BlockSpec((1, tb), lambda i: (i, 0)),
        ),
        compiler_params=pltpu.CompilerParams(
            # v7x has 2 TensorCores: shard the batch axis across them.
            dimension_semantics=("parallel",),
            vmem_limit_bytes=_vmem_limit_bytes(),
        ),
    )(x,
      w1_p, b1_p,
      w2_p, b2_p,
      w3_p, b3_p,
      w4_p, b4_s)

    return out.reshape(-1)[:B]


def init_params(key, in_dim, h_dim):
    """Deterministic init mimicking PyTorch nn.Linear default
    (uniform(-1/sqrt(fan_in), 1/sqrt(fan_in)) for both W and b)."""
    dims = [in_dim, h_dim * 4, h_dim * 2, h_dim, 1]
    params = []
    for i in range(4):
        fan_in, fan_out = dims[i], dims[i + 1]
        key, kw, kb = jax.random.split(key, 3)
        bound = 1.0 / (fan_in ** 0.5)
        w = jax.random.uniform(kw, (fan_in, fan_out), jnp.float32, -bound, bound)
        b = jax.random.uniform(kb, (1, fan_out), jnp.float32, -bound, bound)
        params.append((w, b))
    return params


def reference_forward(x, params):
    h = x
    for i, (w, b) in enumerate(params):
        h = h @ w + b
        if i < 3:
            h = jnp.where(h > 0, h, LEAKY_SLOPE * h)
        else:
            h = jax.nn.sigmoid(h)
    return h[:, 0]


if __name__ == "__main__":
    # Small shapes consistent with the module: image_size=(1, 16, 16) -> D=256,
    # h_dim=32, batch=2. (Real MNIST: D=784; handled identically.)
    B = 2
    image_size = (1, 16, 16)
    D = image_size[0] * image_size[1] * image_size[2]
    h_dim = 32

    key = jax.random.PRNGKey(0)
    key, kx = jax.random.split(key)
    # Torch forward receives (batch, 1, H, W)-style input that the Linear
    # consumes flattened; build the flattened (B, D) view.
    x_img = jax.random.normal(kx, (B,) + image_size, jnp.float32)
    x = x_img.reshape(B, D)

    params = init_params(key, D, h_dim)

    out = jax.block_until_ready(mnist_discriminator(x, params))
    ref = reference_forward(x, params)

    assert out.shape == (B,), out.shape
    # bf16 matmul operands -> loosened tolerance vs the pure-f32 reference.
    assert jnp.allclose(out, ref, atol=2e-2, rtol=2e-2), (out, ref)

    print("KERNEL_OK")
</pallas_src>

<mosaic_0001>
module attributes {stable_mosaic.version = 11 : i64} {
  func.func @mnist_disc_kernel(%arg0: i32, %arg1: memref<2x256xf32, #tpu.memory_space<vmem>>, %arg2: memref<256x128xbf16, #tpu.memory_space<vmem>>, %arg3: memref<1x128xf32, #tpu.memory_space<vmem>>, %arg4: memref<128x128xbf16, #tpu.memory_space<vmem>>, %arg5: memref<1x128xf32, #tpu.memory_space<vmem>>, %arg6: memref<128x128xbf16, #tpu.memory_space<vmem>>, %arg7: memref<1x128xf32, #tpu.memory_space<vmem>>, %arg8: memref<1x128xf32, #tpu.memory_space<vmem>>, %arg9: memref<1xf32, #tpu.memory_space<smem>>, %arg10: memref<1x2xf32, #tpu.memory_space<vmem>>) attributes {dimension_semantics = [#tpu.dimension_semantics<parallel>], iteration_bounds = array<i64: 1>, scalar_prefetch = 0 : i64, scratch_operands = 0 : i64, tpu.core_type = #tpu.core_type<tc>, window_params = [{transform_indices = @transform_0, window_bounds = array<i64: 2, 256>}, {pipeline_mode = #tpu.pipeline_mode<synchronous>, transform_indices = @transform_1, window_bounds = array<i64: 256, 128>}, {pipeline_mode = #tpu.pipeline_mode<synchronous>, transform_indices = @transform_2, window_bounds = array<i64: 1, 128>}, {pipeline_mode = #tpu.pipeline_mode<synchronous>, transform_indices = @transform_3, window_bounds = array<i64: 128, 128>}, {pipeline_mode = #tpu.pipeline_mode<synchronous>, transform_indices = @transform_4, window_bounds = array<i64: 1, 128>}, {pipeline_mode = #tpu.pipeline_mode<synchronous>, transform_indices = @transform_5, window_bounds = array<i64: 128, 128>}, {pipeline_mode = #tpu.pipeline_mode<synchronous>, transform_indices = @transform_6, window_bounds = array<i64: 1, 128>}, {pipeline_mode = #tpu.pipeline_mode<synchronous>, transform_indices = @transform_7, window_bounds = array<i64: 1, 128>}, {transform_indices = @transform_8, window_bounds = array<i64: 1>}, {transform_indices = @transform_9, window_bounds = array<i64: 1, 2>}]} {
    %c0 = arith.constant 0 : index
    %c0_0 = arith.constant 0 : index
    %0 = vector.load %arg1[%c0, %c0_0] : memref<2x256xf32, #tpu.memory_space<vmem>>, vector<2x256xf32>
    %1 = arith.truncf %0 : vector<2x256xf32> to vector<2x256xbf16>
    %c0_1 = arith.constant 0 : index
    %c0_2 = arith.constant 0 : index
    %2 = vector.load %arg2[%c0_1, %c0_2] : memref<256x128xbf16, #tpu.memory_space<vmem>>, vector<256x128xbf16>
    %cst = arith.constant dense<0.000000e+00> : vector<2x128xf32>
    %3 = tpu.matmul %1, %2, %cst {dimension_numbers = #tpu.dot_dimension_numbers<[1], [0], [0], [1], [0, 0, 1, 1], [], []>} : vector<2x256xbf16>, vector<256x128xbf16>, vector<2x128xf32> -> vector<2x128xf32>
    %c0_3 = arith.constant 0 : index
    %c0_4 = arith.constant 0 : index
    %4 = vector.load %arg3[%c0_3, %c0_4] : memref<1x128xf32, #tpu.memory_space<vmem>>, vector<1x128xf32>
    %5 = vector.broadcast %4 : vector<1x128xf32> to vector<2x128xf32>
    %6 = arith.addf %3, %5 : vector<2x128xf32>
    %cst_5 = arith.constant 0.000000e+00 : f32
    %7 = vector.broadcast %cst_5 : f32 to vector<2x128xf32>
    %8 = arith.cmpf ogt, %6, %7 : vector<2x128xf32>
    %cst_6 = arith.constant 0.00999999977 : f32
    %9 = vector.broadcast %cst_6 : f32 to vector<2x128xf32>
    %10 = arith.mulf %9, %6 : vector<2x128xf32>
    %11 = arith.select %8, %6, %10 : vector<2x128xi1>, vector<2x128xf32>
    %12 = arith.truncf %11 : vector<2x128xf32> to vector<2x128xbf16>
    %c0_7 = arith.constant 0 : index
    %c0_8 = arith.constant 0 : index
    %13 = vector.load %arg4[%c0_7, %c0_8] : memref<128x128xbf16, #tpu.memory_space<vmem>>, vector<128x128xbf16>
    %cst_9 = arith.constant dense<0.000000e+00> : vector<2x128xf32>
    %14 = tpu.matmul %12, %13, %cst_9 {dimension_numbers = #tpu.dot_dimension_numbers<[1], [0], [0], [1], [0, 0, 1, 1], [], []>} : vector<2x128xbf16>, vector<128x128xbf16>, vector<2x128xf32> -> vector<2x128xf32>
    %c0_10 = arith.constant 0 : index
    %c0_11 = arith.constant 0 : index
    %15 = vector.load %arg5[%c0_10, %c0_11] : memref<1x128xf32, #tpu.memory_space<vmem>>, vector<1x128xf32>
    %16 = vector.broadcast %15 : vector<1x128xf32> to vector<2x128xf32>
    %17 = arith.addf %14, %16 : vector<2x128xf32>
    %cst_12 = arith.constant 0.000000e+00 : f32
    %18 = vector.broadcast %cst_12 : f32 to vector<2x128xf32>
    %19 = arith.cmpf ogt, %17, %18 : vector<2x128xf32>
    %cst_13 = arith.constant 0.00999999977 : f32
    %20 = vector.broadcast %cst_13 : f32 to vector<2x128xf32>
    %21 = arith.mulf %20, %17 : vector<2x128xf32>
    %22 = arith.select %19, %17, %21 : vector<2x128xi1>, vector<2x128xf32>
    %23 = arith.truncf %22 : vector<2x128xf32> to vector<2x128xbf16>
    %c0_14 = arith.constant 0 : index
    %c0_15 = arith.constant 0 : index
    %24 = vector.load %arg6[%c0_14, %c0_15] : memref<128x128xbf16, #tpu.memory_space<vmem>>, vector<128x128xbf16>
    %cst_16 = arith.constant dense<0.000000e+00> : vector<2x128xf32>
    %25 = tpu.matmul %23, %24, %cst_16 {dimension_numbers = #tpu.dot_dimension_numbers<[1], [0], [0], [1], [0, 0, 1, 1], [], []>} : vector<2x128xbf16>, vector<128x128xbf16>, vector<2x128xf32> -> vector<2x128xf32>
    %c0_17 = arith.constant 0 : index
    %c0_18 = arith.constant 0 : index
    %26 = vector.load %arg7[%c0_17, %c0_18] : memref<1x128xf32, #tpu.memory_space<vmem>>, vector<1x128xf32>
    %27 = vector.broadcast %26 : vector<1x128xf32> to vector<2x128xf32>
    %28 = arith.addf %25, %27 : vector<2x128xf32>
    %cst_19 = arith.constant 0.000000e+00 : f32
    %29 = vector.broadcast %cst_19 : f32 to vector<2x128xf32>
    %30 = arith.cmpf ogt, %28, %29 : vector<2x128xf32>
    %cst_20 = arith.constant 0.00999999977 : f32
    %31 = vector.broadcast %cst_20 : f32 to vector<2x128xf32>
    %32 = arith.mulf %31, %28 : vector<2x128xf32>
    %33 = arith.select %30, %28, %32 : vector<2x128xi1>, vector<2x128xf32>
    %c0_21 = arith.constant 0 : index
    %c0_22 = arith.constant 0 : index
    %34 = vector.load %arg8[%c0_21, %c0_22] : memref<1x128xf32, #tpu.memory_space<vmem>>, vector<1x128xf32>
    "tpu.trace_start"() <{level = 10 : i32, message = "oh,bh->ob"}> : () -> ()
    %cst_23 = arith.constant dense<0.000000e+00> : vector<1x2xf32>
    %35 = tpu.matmul %34, %33, %cst_23 {dimension_numbers = #tpu.dot_dimension_numbers<[1], [1], [0], [0], [0, 0, 1, 0], [], []>} : vector<1x128xf32>, vector<2x128xf32>, vector<1x2xf32> -> vector<1x2xf32>
    "tpu.trace_stop"() : () -> ()
    %c0_24 = arith.constant 0 : index
    %36 = memref.load %arg9[%c0_24] : memref<1xf32, #tpu.memory_space<smem>>
    %37 = vector.broadcast %36 : f32 to vector<1x2xf32>
    %38 = arith.addf %35, %37 : vector<1x2xf32>
    %cst_25 = arith.constant 0.000000e+00 : f32
    %39 = vector.broadcast %cst_25 : f32 to vector<1x2xf32>
    %40 = arith.subf %39, %38 : vector<1x2xf32>
    %41 = math.exp %40 : vector<1x2xf32>
    %cst_26 = arith.constant 1.000000e+00 : f32
    %42 = vector.broadcast %cst_26 : f32 to vector<1x2xf32>
    %43 = arith.addf %42, %41 : vector<1x2xf32>
    %cst_27 = arith.constant 1.000000e+00 : f32
    %44 = vector.broadcast %cst_27 : f32 to vector<1x2xf32>
    %45 = arith.divf %44, %43 : vector<1x2xf32>
    %c0_28 = arith.constant 0 : index
    %c0_29 = arith.constant 0 : index
    %46 = vector.load %arg10[%c0_28, %c0_29] : memref<1x2xf32, #tpu.memory_space<vmem>>, vector<1x2xf32>
    tpu.vector_store %arg10[%c0_28, %c0_29], %45 {strides = array<i32>} : memref<1x2xf32, #tpu.memory_space<vmem>>, vector<1x2xf32>,
    return
  }
  func.func @transform_0(%arg0: i32) -> (i32, i32) {
    %c0_i32 = arith.constant 0 : i32
    %c0_i32_0 = arith.constant 0 : i32
    return %arg0, %c0_i32 : i32, i32
  }
  func.func @transform_1(%arg0: i32) -> (i32, i32) {
    %c0_i32 = arith.constant 0 : i32
    %c0_i32_0 = arith.constant 0 : i32
    %c0_i32_1 = arith.constant 0 : i32
    return %c0_i32, %c0_i32_0 : i32, i32
  }
  func.func @transform_2(%arg0: i32) -> (i32, i32) {
    %c0_i32 = arith.constant 0 : i32
    %c0_i32_0 = arith.constant 0 : i32
    %c0_i32_1 = arith.constant 0 : i32
    return %c0_i32, %c0_i32_0 : i32, i32
  }
  func.func @transform_3(%arg0: i32) -> (i32, i32) {
    %c0_i32 = arith.constant 0 : i32
    %c0_i32_0 = arith.constant 0 : i32
    %c0_i32_1 = arith.constant 0 : i32
    return %c0_i32, %c0_i32_0 : i32, i32
  }
  func.func @transform_4(%arg0: i32) -> (i32, i32) {
    %c0_i32 = arith.constant 0 : i32
    %c0_i32_0 = arith.constant 0 : i32
    %c0_i32_1 = arith.constant 0 : i32
    return %c0_i32, %c0_i32_0 : i32, i32
  }
  func.func @transform_5(%arg0: i32) -> (i32, i32) {
    %c0_i32 = arith.constant 0 : i32
    %c0_i32_0 = arith.constant 0 : i32
    %c0_i32_1 = arith.constant 0 : i32
    return %c0_i32, %c0_i32_0 : i32, i32
  }
  func.func @transform_6(%arg0: i32) -> (i32, i32) {
    %c0_i32 = arith.constant 0 : i32
    %c0_i32_0 = arith.constant 0 : i32
    %c0_i32_1 = arith.constant 0 : i32
    return %c0_i32, %c0_i32_0 : i32, i32
  }
  func.func @transform_7(%arg0: i32) -> (i32, i32) {
    %c0_i32 = arith.constant 0 : i32
    %c0_i32_0 = arith.constant 0 : i32
    %c0_i32_1 = arith.constant 0 : i32
    return %c0_i32, %c0_i32_0 : i32, i32
  }
  func.func @transform_8(%arg0: i32) -> i32 {
    %c0_i32 = arith.constant 0 : i32
    %c0_i32_0 = arith.constant 0 : i32
    return %c0_i32 : i32
  }
  func.func @transform_9(%arg0: i32) -> (i32, i32) {
    %c0_i32 = arith.constant 0 : i32
    %c0_i32_0 = arith.constant 0 : i32
    return %arg0, %c0_i32 : i32, i32
  }
}

</mosaic_0001>

<bundles_post_ra>
// kernel: tpu_custom_call.1
= control target key start
LH: loop header
LB: loop body
LE: loop exit
PB: predicated region body
PF: predicated region fallthrough
CT: control target
= control target key end

     0   :  { %15 = vsyncpa [#allocation4], 0  ;;  %s1060_s0 = inlined_call_operand.hbm [shape: f32[2,256], index: 0, kind: input, shape index: {}]   ;;  %s1061_s1 = inlined_call_operand.hbm [shape: bf16[256,128], index: 1, kind: input, shape index: {}]   ;;  %s1062_s2 = inlined_call_operand.vmem [shape: f32[1,128], index: 2, kind: input, shape index: {}]   ;;  %s1063_s3 = inlined_call_operand.hbm [shape: bf16[128,128], index: 3, kind: input, shape index: {}]   ;;  %s1064_s4 = inlined_call_operand.vmem [shape: f32[1,128], index: 4, kind: input, shape index: {}]   ;;  %s1065_s5 = inlined_call_operand.hbm [shape: bf16[128,128], index: 5, kind: input, shape index: {}]   ;;  %s1066_s6 = inlined_call_operand.vmem [shape: f32[1,128], index: 6, kind: input, shape index: {}]   ;;  %s1067_s7 = inlined_call_operand.vmem [shape: f32[1,128], index: 7, kind: input, shape index: {}]   ;;  %s1068_s8 = inlined_call_operand.<no memory space> [shape: f32[1], index: 8, kind: input, shape index: {}]   ;;  %s1069_s9 = inlined_call_operand.hbm [shape: f32[1,2], index: 9, kind: output, shape index: {}]  }
   0x1   :  { %16 = vsyncpa [#allocation7], 0 }
   0x2   :  { %17 = vsyncpa [#allocation10], 0 }
   0x3   :  { %18 = vsyncpa [#allocation5], 0  ;;  %s894_s30 = smov [#allocation6]   ;;  %s776_s13 = scalar_lea.hbm %s1061_s1, 2048 }
   0x4   :  { %s34_s10 = sshll.u32 %s894_s30, 4  ;;  %p777_p0 = scmp.ne.s32.totalorder %s1061_s1, %s776_s13  ;;  %s35_s10 = int_to_ptr.vmem [resolvable:$true] %s34_s10 }
   0x5   :  { %p780_p1 = scmp.lt.u32.totalorder %s776_s13, %s1061_s1 }
   0x7   :  { %p782_p2 = pnand %p780_p1, %p777_p0 }
   0x9   :  { %785 = shalt.err (!%p782_p2)
}
   0xa   :  { %s786_s18 = scalar_lea.vmem %s35_s10, 2048  ;;  %p791_p4 = scmp.lt.s32.totalorder %s35_s10, %s35_s10 }
   0xb   :  { %p787_p3 = scmp.ne.s32.totalorder %s35_s10, %s786_s18  ;;  %p792_p5 = scmp.lt.s32.totalorder %s786_s18, %s786_s18 }
   0xd   :  { %p793_p6 = por %p792_p5, %p791_p4 }
   0xf   :  { %p794_p7 = pnand %p793_p6, %p787_p3 }
  0x11   :  { %797 = shalt.err (!%p794_p7)
}
  0x12   :  { %s895_s19 = smov 64   ;;  %s896_s20 = smov 4  }
  0x13   :  { %40 = dma.hbm_to_vmem [thread:$0]  %s1061_s1, 2048, %s35_s10, [#allocation7], %s895_s19, %s895_s19, %s896_s20  }
  0x14   :  { %s897_s23 = smov [#allocation3]   ;;  %s898_s25 = smov [#allocation8]  }
  0x15   :  { %s25_s24 = sshll.u32 %s897_s23, 4  ;;  %s48_s26 = sshll.u32 %s898_s25, 4  ;;  %s26_s24 = int_to_ptr.vmem [resolvable:$true] %s25_s24  ;;  %s49_s26 = int_to_ptr.vmem [resolvable:$true] %s48_s26 }
  0x16   :  { %s798_s29 = scalar_lea.hbm %s1060_s0, 64 }
  0x17   :  { %p799_p8 = scmp.ne.s32.totalorder %s1060_s0, %s798_s29  ;;  %p802_p9 = scmp.lt.u32.totalorder %s798_s29, %s1060_s0 }
  0x19   :  { %p804_p10 = pnand %p802_p9, %p799_p8 }
  0x1b   :  { %807 = shalt.err (!%p804_p10)
}
  0x1c   :  { %s808_s1 = scalar_lea.vmem %s26_s24, 64  ;;  %p813_p12 = scmp.lt.s32.totalorder %s26_s24, %s26_s24 }
  0x1d   :  { %p809_p11 = scmp.ne.s32.totalorder %s26_s24, %s808_s1  ;;  %p814_p13 = scmp.lt.s32.totalorder %s808_s1, %s808_s1 }
  0x1f   :  { %p815_p0 = por %p814_p13, %p813_p12 }
  0x21   :  { %p816_p1 = pnand %p815_p0, %p809_p11 }
  0x23   :  { %819 = shalt.err (!%p816_p1)
}
  0x24   :  { %28 = dma.hbm_to_vmem [thread:$0]  %s1060_s0, 64, %s26_s24, [#allocation4]  }
  0x25   :  { %s820_s17 = scalar_lea.hbm %s1063_s3, 1024 }
  0x26   :  { %p821_p2 = scmp.ne.s32.totalorder %s1063_s3, %s820_s17  ;;  %p824_p3 = scmp.lt.u32.totalorder %s820_s17, %s1063_s3 }
  0x28   :  { %p826_p4 = pnand %p824_p3, %p821_p2 }
  0x2a   :  { %829 = shalt.err (!%p826_p4)
}
  0x2b   :  { %s830_s25 = scalar_lea.vmem %s49_s26, 1024  ;;  %p835_p6 = scmp.lt.s32.totalorder %s49_s26, %s49_s26 }
  0x2c   :  { %p831_p5 = scmp.ne.s32.totalorder %s49_s26, %s830_s25  ;;  %p836_p7 = scmp.lt.s32.totalorder %s830_s25, %s830_s25 }
  0x2e   :  { %p837_p8 = por %p836_p7, %p835_p6 }
  0x30   :  { %p838_p9 = pnand %p837_p8, %p831_p5 }
  0x32   :  { %841 = shalt.err (!%p838_p9)
}
  0x33   :  { %54 = dma.hbm_to_vmem [thread:$0]  %s1063_s3, 1024, %s49_s26, [#allocation7], %s895_s19, %s895_s19, %s896_s20  }
  0x34   :  { %s899_s27 = smov [#allocation9]   ;;  %s842_s11 = scalar_lea.hbm %s1065_s5, 1024 }
  0x35   :  { %s62_s28 = sshll.u32 %s899_s27, 4  ;;  %p843_p10 = scmp.ne.s32.totalorder %s1065_s5, %s842_s11  ;;  %s63_s28 = int_to_ptr.vmem [resolvable:$true] %s62_s28 }
  0x36   :  { %p846_p11 = scmp.lt.u32.totalorder %s842_s11, %s1065_s5 }
  0x38   :  { %p848_p12 = pnand %p846_p11, %p843_p10 }
  0x3a   :  { %851 = shalt.err (!%p848_p12)
}
  0x3b   :  { %s852_s14 = scalar_lea.vmem %s63_s28, 1024  ;;  %p857_p0 = scmp.lt.s32.totalorder %s63_s28, %s63_s28 }
  0x3c   :  { %p853_p13 = scmp.ne.s32.totalorder %s63_s28, %s852_s14  ;;  %p858_p1 = scmp.lt.s32.totalorder %s852_s14, %s852_s14 }
  0x3e   :  { %p859_p2 = por %p858_p1, %p857_p0 }
  0x40   :  { %p860_p3 = pnand %p859_p2, %p853_p13 }
  0x42   :  { %863 = shalt.err (!%p860_p3)
}
  0x43   :  { %68 = dma.hbm_to_vmem [thread:$0]  %s1065_s5, 1024, %s63_s28, [#allocation10], %s895_s19, %s895_s19, %s896_s20  }
  0x44   :  { %886 = dma.done.wait [#allocation4], 64  }
  0x45   :  { %887 = vsyncadd [#allocation4], 4294967232 }
  0x46   :  { %888 = dma.done.wait [#allocation7], 3072  }
  0x47   :  { %889 = vsyncadd [#allocation7], 4294964224 }
  0x48   :  { %890 = dma.done.wait [#allocation10], 1024  }
  0x49   :  { %891 = vsyncadd [#allocation10], 4294966272  ;;  %v900_v0 = vmov 0.0   ;;  %v740_v1 = vld [vmem:[#allocation6 + $0x40] sm:$0xff]   ;;  %v742_v3 = vld [vmem:[#allocation6 + $0x48] sm:$0xff]   ;;  %vm901_vm0 = vmmov 0  }
  0x4a   :  { %686 = vmatprep.subr.bf16.mxu1 %v900_v0  ;;  %v741_v2 = vld [vmem:[#allocation6] sm:$0xff]   ;;  %644 = vmatprep.subr.bf16.mxu0 %v740_v1  ;;  %v743_v4 = vld [vmem:[#allocation6 + $0x8] sm:$0xff]   ;;  %v744_v5 = vld [vmem:[#allocation6 + $0x50] sm:$0xff]   ;;  %v512_v1 = vstv %s1068_s8  ;;  %vm589_vm4 = vcmask 8192  }
  0x4b   :  { %645 = vmatpush3.bf16.msra.mxu0 %v741_v2  ;;  %v745_v6 = vld [vmem:[#allocation6 + $0x10] sm:$0xff]   ;;  %v746_v7 = vld [vmem:[#allocation6 + $0x58] sm:$0xff]   ;;  %v748_v9 = vld [vmem:[#allocation6 + $0x60] sm:$0xff]   ;;  %702 = vmatprep.mubr.msk.bf16.mxu1 %vm901_vm0, %v900_v0 }
  0x4c   :  { %646 = vmatprep.subr.bf16.mxu0 %v742_v3  ;;  %v747_v8 = vld [vmem:[#allocation6 + $0x18] sm:$0xff]   ;;  %v749_v10 = vld [vmem:[#allocation6 + $0x20] sm:$0xff]   ;;  %v750_v11 = vld [vmem:[#allocation6 + $0x68] sm:$0xff]  }
  0x4d   :  { %v608_v12 = vld.sshfl [vmem:[#allocation3] sm:$0x33 pattern:$0x76325410]  ;;  %v756_v14 = vld [vmem:[#allocation8] sm:$0xff]   ;;  %v751_v15 = vld [vmem:[#allocation6 + $0x28] sm:$0xff]  }
  0x4e   :  { %v97_v13 = vcombine.high %v608_v12, %v608_v12  ;;  %687 = vmatpush3.bf16.msra.mxu1 %v756_v14  ;;  %v757_v17 = vld [vmem:[#allocation8 + $0x8] sm:$0xff]   ;;  %v752_v18 = vld [vmem:[#allocation6 + $0x70] sm:$0xff]   ;;  %v754_v21 = vld [vmem:[#allocation6 + $0x78] sm:$0xff]   ;;  %v100_v24 = vpack.c.bf16 %v608_v12, %v608_v12 }
  0x4f   :  { %647 = vmatpush3.bf16.msra.mxu0 %v743_v4  ;;  %688 = vmatprep.subr.bf16.mxu1 %v900_v0  ;;  %v753_v19 = vld [vmem:[#allocation6 + $0x30] sm:$0xff]   ;;  %v755_v22 = vld [vmem:[#allocation6 + $0x38] sm:$0xff]   ;;  %v760_v25 = vld [vmem:[#allocation8 + $0x20] sm:$0xff]  }
  0x50   :  { %648 = vmatprep.subr.bf16.mxu0 %v744_v5  ;;  %v101_v16 = vpack.c.bf16 %v97_v13, %v97_v13  ;;  %v758_v20 = vld [vmem:[#allocation8 + $0x10] sm:$0xff]   ;;  %v759_v23 = vld [vmem:[#allocation8 + $0x18] sm:$0xff]   ;;  %v761_v26 = vld [vmem:[#allocation8 + $0x28] sm:$0xff]  }
  0x51   :  { %v762_v27 = vld [vmem:[#allocation8 + $0x30] sm:$0xff]   ;;  %v763_v28 = vld [vmem:[#allocation8 + $0x38] sm:$0xff]   ;;  %v764_v29 = vld [vmem:[#allocation9] sm:$0xff]  }
  0x52   :  { %269 = vmatprep.mubr.bf16.mxu0 %v101_v16  ;;  %689 = vmatpush3.bf16.msra.mxu1 %v757_v17  ;;  %v765_v30 = vld [vmem:[#allocation9 + $0x8] sm:$0xff]   ;;  %v766_v31 = vld [vmem:[#allocation9 + $0x10] sm:$0xff]   ;;  %v767_v32 = vld [vmem:[#allocation9 + $0x18] sm:$0xff]  }
  0x53   :  { %649 = vmatpush3.bf16.msra.mxu0 %v745_v6  ;;  %690 = vmatprep.subr.bf16.mxu1 %v900_v0  ;;  %v768_v33 = vld [vmem:[#allocation9 + $0x20] sm:$0xff]   ;;  %v769_v34 = vld [vmem:[#allocation9 + $0x28] sm:$0xff]   ;;  %v609_v36 = vld [vmem:[%s1062_s2] ss:$0 sm:$0xff] }
  0x54   :  { %650 = vmatprep.subr.bf16.mxu0 %v746_v7  ;;  %v770_v45 = vld [vmem:[#allocation9 + $0x30] sm:$0xff]   ;;  %v771_v46 = vld [vmem:[#allocation9 + $0x38] sm:$0xff]  }
  0x55   :  { %v626_v47 = vld [vmem:[%s1064_s4] ss:$0 sm:$0xff] }
  0x56   :  { %691 = vmatpush3.bf16.msra.mxu1 %v758_v20  ;;  %v635_v56 = vld [vmem:[%s1066_s6] ss:$0 sm:$0xff]  ;;  %s902_s6 = smov [#allocation11]  }
  0x57   :  { %651 = vmatpush3.bf16.msra.mxu0 %v747_v8  ;;  %692 = vmatprep.subr.bf16.mxu1 %v900_v0  ;;  %s597_s22 = sshll.u32 %s902_s6, 4  ;;  %s598_s22 = int_to_ptr.vmem [resolvable:$true] %s597_s22 }
  0x58   :  { %652 = vmatprep.subr.bf16.mxu0 %v748_v9  ;;  %s868_s23 = scalar_lea.vmem %s598_s22, 32  ;;  %p869_p5 = scmp.lt.s32.totalorder %s598_s22, %s598_s22 }
  0x5a   :  { %693 = vmatpush3.bf16.msra.mxu1 %v759_v23 }
  0x5b   :  { %653 = vmatpush3.bf16.msra.mxu0 %v749_v10  ;;  %694 = vmatprep.subr.bf16.mxu1 %v900_v0 }
  0x5c   :  { %654 = vmatprep.subr.bf16.mxu0 %v750_v11 }
  0x5e   :  { %695 = vmatpush3.bf16.msra.mxu1 %v760_v25 }
  0x5f   :  { %655 = vmatpush3.bf16.msra.mxu0 %v751_v15  ;;  %696 = vmatprep.subr.bf16.mxu1 %v900_v0 }
  0x60   :  { %656 = vmatprep.subr.bf16.mxu0 %v752_v18 }
  0x62   :  { %697 = vmatpush3.bf16.msra.mxu1 %v761_v26 }
  0x63   :  { %657 = vmatpush3.bf16.msra.mxu0 %v753_v19  ;;  %698 = vmatprep.subr.bf16.mxu1 %v900_v0 }
  0x64   :  { %658 = vmatprep.subr.bf16.mxu0 %v754_v21 }
  0x66   :  { %699 = vmatpush3.bf16.msra.mxu1 %v762_v27 }
  0x67   :  { %659 = vmatpush3.bf16.msra.mxu0 %v755_v22  ;;  %700 = vmatprep.subr.bf16.mxu1 %v900_v0 }
  0x68   :  { %706 = vmatprep.subr.bf16.mxu0 %v900_v0 }
  0x6a   :  { %270 = vmatmul.mubr.bf16.vlgmr.msra.gmra.mrb[0].mxu0 %v100_v24  ;;  %701 = vmatpush3.bf16.msra.mxu1 %v763_v28 }
  0x6b   :  { %722 = vmatprep.mubr.msk.bf16.mxu0 %vm901_vm0, %v900_v0  ;;  %726 = vmatprep.subr.mxu1 %v900_v0 }
  0x6c   :  { %707 = vmatpush3.bf16.msra.mxu0 %v764_v29 }
  0x6d   :  { %708 = vmatprep.subr.bf16.mxu0 %v900_v0 }
  0x70   :  { %709 = vmatpush3.bf16.msra.mxu0 %v765_v30 }
  0x71   :  { %710 = vmatprep.subr.bf16.mxu0 %v900_v0 }
  0x74   :  { %711 = vmatpush3.bf16.msra.mxu0 %v766_v31 }
  0x75   :  { %712 = vmatprep.subr.bf16.mxu0 %v900_v0 }
  0x78   :  { %713 = vmatpush3.bf16.msra.mxu0 %v767_v32 }
  0x79   :  { %714 = vmatprep.subr.bf16.mxu0 %v900_v0 }
  0x7c   :  { %715 = vmatpush3.bf16.msra.mxu0 %v768_v33 }
  0x7d   :  { %716 = vmatprep.subr.bf16.mxu0 %v900_v0 }
  0x80   :  { %717 = vmatpush3.bf16.msra.mxu0 %v769_v34 }
  0x81   :  { %718 = vmatprep.subr.bf16.mxu0 %v900_v0 }
  0x84   :  { %719 = vmatpush3.bf16.msra.mxu0 %v770_v45 }
  0x85   :  { %720 = vmatprep.subr.bf16.mxu0 %v900_v0 }
  0x88   :  { %721 = vmatpush3.bf16.msra.mxu0 %v771_v46 }
 0x13d   :  { %v660_v35 = vpop.f32.mrb[0].mxu0 }
 0x13e   :  { %v661_v37 = vpop.f32.mrb[1].mxu0 }
 0x13f   :  { %v662_v38 = vadd.f32 %v661_v37, %v660_v35  ;;  %v663_v39 = vpop.f32.mrb[2].mxu0 }
 0x140   :  { %v664_v40 = vpop.f32.mrb[3].mxu0 }
 0x141   :  { %v272_v41 = vadd.f32 %v662_v38, %v609_v36 }
 0x143   :  { %v278_v42 = vmul.f32 0.01, %v272_v41  ;;  %vm277_vm1 = vcmp.gt.f32.partialorder %v272_v41, 0.0 }
 0x145   :  { %v279_v43 = vsel %vm277_vm1, %v272_v41, %v278_v42 }
 0x146   :  { %v280_v44 = vpack.c.bf16 %v279_v43, %v279_v43 }
 0x148   :  { %703 = vmatmul.mubr.bf16.vlgmr.msra.gmra.mrb[0].mxu1 %v280_v44 }
 0x149   :  { %728 = vmatprep.mubr.msk.f32.mxu1 %vm901_vm0, %v900_v0  ;;  %v510_v0 = vld [vmem:[%s1067_s7] sm:$0x1]  ;;  %s864_s7 = scalar_lea.vmem %s598_s22, 16 }
 0x14a   :  { %p865_p4 = scmp.ne.s32.totalorder %s598_s22, %s864_s7  ;;  %p870_p6 = scmp.lt.s32.totalorder %s868_s23, %s864_s7 }
 0x14c   :  { %p871_p7 = por %p870_p6, %p869_p5 }
 0x14e   :  { %p872_p8 = pnand %p871_p7, %p865_p4 }
 0x21b   :  { %v386_v48 = vpop.f32.mrb[0].mxu1 }
 0x21c   :  { %v387_v49 = vadd.f32 %v626_v47, %v386_v48  ;;  %v704_v50 = vpop.f32.mrb[1].mxu1 }
 0x21d   :  { %v389_v51 = vpop.f32.mrb[2].mxu1 }
 0x21e   :  { %vm392_vm2 = vcmp.gt.f32.partialorder %v387_v49, 0.0  ;;  %v393_v52 = vmul.f32 0.01, %v387_v49  ;;  %v705_v53 = vpop.f32.mrb[3].mxu1 }
 0x220   :  { %v394_v54 = vsel %vm392_vm2, %v387_v49, %v393_v52 }
 0x221   :  { %v395_v55 = vpack.c.bf16 %v394_v54, %v394_v54 }
 0x223   :  { %723 = vmatmul.mubr.bf16.vlgmr.msra.gmra.mrb[4].mxu0 %v395_v55 }
 0x2f6   :  { %v501_v57 = vpop.f32.mrb[4].mxu0 }
 0x2f7   :  { %v502_v58 = vadd.f32 %v635_v56, %v501_v57  ;;  %v724_v59 = vpop.f32.mrb[5].mxu0 }
 0x2f8   :  { %v504_v60 = vpop.f32.mrb[6].mxu0 }
 0x2f9   :  { %vm507_vm3 = vcmp.gt.f32.partialorder %v502_v58, 0.0  ;;  %v508_v61 = vmul.f32 0.01, %v502_v58  ;;  %v725_v62 = vpop.f32.mrb[7].mxu0 }
 0x2fb   :  { %v509_v63 = vsel %vm507_vm3, %v502_v58, %v508_v61 }
 0x2fc   :  { %727 = vmatpush3.xpose.msra.mxu1 %v509_v63 }
 0x2ff   :  { %729 = vmatmul.mubr.f32.vlgmr.msra.gmra.mrb[4].mxu1 %v510_v0 }
 0x3d2   :  { %v579_v2 = vpop.f32.mrb[4].mxu1 }
 0x3d3   :  { %v580_v3 = vadd.f32 %v579_v2, %v512_v1  ;;  %v730_v4 = vpop.f32.mrb[5].mxu1 }
 0x3d5   :  { %v583_v5 = vsub.f32 0.0, %v580_v3 }
 0x3d7   :  { %v584_v6 = vmul.f32 1.442695, %v583_v5 }
 0x3d9   :  { %772 = vpow2.f32 %v584_v6 }
 0x3e3   :  { %v773_v7 = vpop.eup %772 }
 0x3e4   :  { %v586_v8 = vadd.f32 1.0, %v773_v7 }
 0x3e6   :  { %774 = vrcp.f32 %v586_v8 }
 0x3f0   :  { %v775_v9 = vpop.eup %774 }
 0x3f1   :  { %590 = vst.msk [vmem:[#allocation11] sm:$0x1] %vm589_vm4, %v775_v9 }
 0x3f2   :  { %875 = shalt.err (!%p872_p8)
}
 0x3f3   :  { %s876_s0 = scalar_lea.hbm %s1069_s9, 16 }
 0x3f4   :  { %p877_p9 = scmp.ne.s32.totalorder %s1069_s9, %s876_s0  ;;  %p880_p10 = scmp.lt.u32.totalorder %s876_s0, %s1069_s9 }
 0x3f6   :  { %p882_p11 = pnand %p880_p10, %p877_p9 }
 0x3f8   :  { %885 = shalt.err (!%p882_p11)
}
 0x3f9   :  { %600 = dma.vmem_to_hbm [thread:$0]  %s598_s22, 16, %s1069_s9, [#allocation5]  }
 0x3fa   :  { %892 = dma.done.wait [#allocation5], 16  }
 0x3fb   :  { %893 = vsyncadd [#allocation5], 4294967280 }
 0x3fc   :  { %604 = vsyncpa [#allocation4], 1 }
 0x3fd   :  { %605 = vsyncpa [#allocation7], 1 }
 0x3fe   :  { %606 = vsyncpa [#allocation10], 1 }
 0x3ff   :  { %607 = vsyncpa [#allocation5], 1 }

</bundles_post_ra>
